<compile_context>
chip_gen: v6e
topology: v6e:2x2x1
jax: 0.10.0
libtpu: 0.0.40
codegen_flags: <defaults>
</compile_context>

<pallas_src>
import jax
import jax.numpy as jnp
from jax import lax
from jax.experimental import pallas as pl
from jax.experimental.pallas import tpu as pltpu

_LANE = 128
_COL_CHUNK = 512  # in-kernel column sub-tile (keeps the f32 intermediate in vregs)


def _largest_divisor_leq(n, cap):
    cap = max(1, min(n, int(cap)))
    for d in range(cap, 0, -1):
        if n % d == 0:
            return d
    return 1


def _pick_chunk(thw):
    if thw <= _COL_CHUNK:
        return thw
    c = _COL_CHUNK
    while c >= _LANE:
        if thw % c == 0:
            return c
        c -= _LANE
    return thw  # fallback: single chunk (intermediate spills, still correct)


def _default_target_step_bytes():
    # ~2 MiB of HBM traffic per grid step amortizes the ~0.35us fixed step cost.
    # v7x has ~2x per-TC HBM bandwidth -> use a larger payload; detect it defensively
    # via its smaller (64 MiB) VMEM.  Any failure falls back to the 2 MiB default.
    target = 2 << 20
    try:
        info = pltpu.get_tpu_info()
        vmem = getattr(info, "vmem_capacity_bytes", None)
        if vmem is not None and int(vmem) <= (64 << 20):
            target = 4 << 20
    except Exception:
        pass
    return target


def _make_kernel(nb, thw, chunk):
    n_chunks = thw // chunk if (chunk > 0 and thw % chunk == 0) else 1
    unroll = min(4, max(1, n_chunks))

    def kernel(x_ref, w_fused_t_ref, w_out_t_ref, o_ref):
        # x_ref: (nb, cin, thw)   w_fused_t_ref: (max_width, cin)
        # w_out_t_ref: (cout, max_width)   o_ref: (nb, cout, thw)
        wf = w_fused_t_ref[...]
        wo = w_out_t_ref[...]

        def compute_cols(b, off, width):
            xc = x_ref[b, :, pl.ds(off, width)]
            h = jnp.dot(wf, xc, preferred_element_type=jnp.float32)   # in_proj + stage 1x1 (folded)
            h = jnp.clip(h, 0.0, 6.0).astype(x_ref.dtype)             # stage ReLU6, back to act dtype
            yc = jnp.dot(wo, h, preferred_element_type=jnp.float32)   # out_proj 1x1
            o_ref[b, :, pl.ds(off, width)] = yc.astype(o_ref.dtype)

        for b in range(nb):                     # static unroll over the small batch block
            if n_chunks == 1:
                compute_cols(b, 0, thw)
            else:
                def body(c, carry):
                    compute_cols(b, pl.multiple_of(c * chunk, chunk), chunk)
                    return carry
                lax.fori_loop(0, n_chunks, body, 0, unroll=unroll)

    return kernel


def stage_plus_proj(x_nchw, w_in, w_stage, w_out, *, target_step_bytes=None):
    """x_nchw: (N, cin, H, W) NCHW (PyTorch convention).
    w_in: (cin, max_cin), w_stage: (max_cin, max_width), w_out: (max_width, cout),
    stored as channels-in x channels-out matmul weights of the corresponding 1x1 convs.
    Returns (N, cout, H, W)."""
    N, cin, H, W = x_nchw.shape
    max_cin, max_width = w_stage.shape
    cout = w_out.shape[1]
    HW = H * W
    db = jnp.dtype(x_nchw.dtype).itemsize
    if target_step_bytes is None:
        target_step_bytes = _default_target_step_bytes()

    # NCHW -> (N, cin, H*W): pure reshape of contiguous trailing dims (stays channels-first).
    x3 = x_nchw.reshape(N, cin, HW)

    # Fold in_proj into the linear part of the representative stage ONCE, outside the kernel,
    # and orient / cast weights once so the kernel does no per-iteration casts.
    # TODO(synk): do not fold once the real (nonlinear, multi-block) Stage is plugged in.
    w_fused_t = jnp.transpose(
        jnp.dot(w_in.astype(jnp.float32), w_stage.astype(jnp.float32))
    ).astype(x_nchw.dtype)                                   # (max_width, cin)
    w_out_t = jnp.transpose(w_out).astype(x_nchw.dtype)      # (cout, max_width)

    # ---- tiling selection: chase ~target_step_bytes of HBM traffic per grid step ----
    col_bytes = (cin + cout) * db                            # HBM bytes per spatial column
    target_cols = max(_LANE, target_step_bytes // col_bytes)

    if HW > target_cols and HW > _COL_CHUNK:
        # Large feature map: grid over spatial tiles, one batch element per step.
        thw = (max(_COL_CHUNK, min(target_cols, HW)) // _COL_CHUNK) * _COL_CHUNK
        nb = 1
    else:
        # Small feature map: take the whole HW per step and block several batch elements
        # per step to amortize the fixed per-step overhead.
        thw = HW
        nb = _largest_divisor_leq(N, max(1, target_step_bytes // max(1, col_bytes * HW)))

    n_spatial = pl.cdiv(HW, thw)
    n_batch = N // nb

    # v7x has 2 TensorCores: guarantee >=2 grid steps on a parallel axis.
    if n_batch * n_spatial < 2:
        if HW >= 2 * _LANE and HW % (2 * _LANE) == 0:
            thw = HW // 2
            n_spatial = 2
        elif N >= 2:
            nb = _largest_divisor_leq(N, N // 2)
            n_batch = N // nb

    chunk = _pick_chunk(thw)
    grid = (n_batch, n_spatial)

    # Raise the scoped-VMEM limit (v5e default is only 16 MiB) with margin for the
    # double-buffered blocks plus the in-kernel intermediate.
    x_block = nb * cin * thw * db
    o_block = nb * cout * thw * db
    w_bytes = (max_width * cin + cout * max_width) * db
    h_scratch = max_width * chunk * (4 + db) + cout * chunk * 4
    vmem_est = 2 * (x_block + o_block + w_bytes) + h_scratch
    vmem_limit = int(min(64 << 20, max(2 * vmem_est + (4 << 20), 24 << 20)))

    cost = pl.CostEstimate(
        flops=2 * (max_width * cin + cout * max_width) * N * HW,
        transcendentals=0,
        bytes_accessed=(cin + cout) * N * HW * db + w_bytes,
    )

    out3 = pl.pallas_call(
        _make_kernel(nb, thw, chunk),
        out_shape=jax.ShapeDtypeStruct((N, cout, HW), x_nchw.dtype),
        grid_spec=pltpu.PrefetchScalarGridSpec(
            num_scalar_prefetch=0,
            grid=grid,
            in_specs=[
                # x: (nb, cin, thw) block with thw lane-dense.
                pl.BlockSpec((nb, cin, thw), lambda nbi, s: (nbi, 0, s)),
                # Weights: constant index_map -> stay VMEM-resident across the grid.
                pl.BlockSpec((max_width, cin), lambda nbi, s: (0, 0)),
                pl.BlockSpec((cout, max_width), lambda nbi, s: (0, 0)),
            ],
            out_specs=pl.BlockSpec((nb, cout, thw), lambda nbi, s: (nbi, 0, s)),
        ),
        compiler_params=pltpu.CompilerParams(
            dimension_semantics=("parallel", "parallel"),
            vmem_limit_bytes=vmem_limit,
        ),
        cost_estimate=cost,
    )(x3, w_fused_t, w_out_t)

    # (N, cout, H*W) -> (N, cout, H, W): free reshape, still NCHW.
    return out3.reshape(N, cout, H, W)


def _reference(x_nchw, w_in, w_stage, w_out):
    """Pure-JAX reference of the same forward pass (unfused, all three matmuls)."""
    x = x_nchw.astype(jnp.float32)                                   # NCHW
    h = jnp.einsum("nchw,cd->ndhw", x, w_in.astype(jnp.float32))     # in_proj
    h = jnp.einsum("nchw,cd->ndhw", h, w_stage.astype(jnp.float32))  # stage 1x1
    h = jnp.clip(h, 0.0, 6.0)                                        # stage ReLU6
    o = jnp.einsum("nchw,cd->ndhw", h, w_out.astype(jnp.float32))    # out_proj
    return o.astype(x_nchw.dtype)


def _run_case(name, N, cin, H, W, max_cin, max_width, cout, **kw):
    key = jax.random.PRNGKey(0)
    kx, k1, k2, k3 = jax.random.split(key, 4)
    x = jax.random.normal(kx, (N, cin, H, W), dtype=jnp.float32)
    # 1x1-conv weights (cout, cin, 1, 1) stored transposed as (cin, cout) matmul weights.
    w_in = jax.random.normal(k1, (cin, max_cin), dtype=jnp.float32) * (1.0 / cin) ** 0.5
    w_stage = jax.random.normal(k2, (max_cin, max_width), dtype=jnp.float32) * (1.0 / max_cin) ** 0.5
    w_out = jax.random.normal(k3, (max_width, cout), dtype=jnp.float32) * (1.0 / max_width) ** 0.5

    y = jax.block_until_ready(stage_plus_proj(x, w_in, w_stage, w_out, **kw))
    y_ref = _reference(x, w_in, w_stage, w_out)
    assert y.shape == (N, cout, H, W), (name, y.shape)
    assert jnp.allclose(y, y_ref, atol=2e-4, rtol=2e-4), f"mismatch vs reference ({name})"


if __name__ == "__main__":
    # Primary small config (consistent with StagePlusProj.__init__ shapes):
    #   cin=4, stage.max_cin=32, stage.max_width=32, cout=16
    _run_case("batch-blocked small HW", N=2, cin=4, H=16, W=16,
              max_cin=32, max_width=32, cout=16)
    # Non-128-multiple spatial extent (14x14): full-extent lane block path.
    _run_case("odd HW", N=3, cin=4, H=14, W=14,
              max_cin=32, max_width=32, cout=16)
    # Spatial-tiled path with in-kernel column chunking and a partial tail tile
    # (small target_step_bytes override keeps the test shape tiny).
    _run_case("spatial tiles", N=2, cin=4, H=64, W=64,
              max_cin=32, max_width=32, cout=16, target_step_bytes=128 << 10)

    print("KERNEL_OK")
</pallas_src>

<mosaic_0001>
module attributes {stable_mosaic.version = 11 : i64} {
  func.func @kernel(%arg0: i32, %arg1: i32, %arg2: memref<2x4x128xf32, #tpu.memory_space<vmem>>, %arg3: memref<32x4xf32, #tpu.memory_space<vmem>>, %arg4: memref<16x32xf32, #tpu.memory_space<vmem>>, %arg5: memref<2x16x128xf32, #tpu.memory_space<vmem>>) attributes {dimension_semantics = [#tpu.dimension_semantics<parallel>, #tpu.dimension_semantics<parallel>], iteration_bounds = array<i64: 1, 2>, scalar_prefetch = 0 : i64, scratch_operands = 0 : i64, tpu.core_type = #tpu.core_type<tc>, window_params = [{transform_indices = @transform_0, window_bounds = array<i64: 2, 4, 128>}, {pipeline_mode = #tpu.pipeline_mode<synchronous>, transform_indices = @transform_1, window_bounds = array<i64: 32, 4>}, {pipeline_mode = #tpu.pipeline_mode<synchronous>, transform_indices = @transform_2, window_bounds = array<i64: 16, 32>}, {transform_indices = @transform_3, window_bounds = array<i64: 2, 16, 128>}]} {
    %c0 = arith.constant 0 : index
    %c0_0 = arith.constant 0 : index
    %0 = vector.load %arg3[%c0, %c0_0] : memref<32x4xf32, #tpu.memory_space<vmem>>, vector<32x4xf32>
    %c0_1 = arith.constant 0 : index
    %c0_2 = arith.constant 0 : index
    %1 = vector.load %arg4[%c0_1, %c0_2] : memref<16x32xf32, #tpu.memory_space<vmem>>, vector<16x32xf32>
    %c0_3 = arith.constant 0 : index
    %c0_4 = arith.constant 0 : index
    %c0_5 = arith.constant 0 : index
    %2 = vector.load %arg2[%c0_3, %c0_4, %c0_5] : memref<2x4x128xf32, #tpu.memory_space<vmem>>, vector<1x4x128xf32>
    %3 = vector.shape_cast %2 : vector<1x4x128xf32> to vector<4x128xf32>
    %cst = arith.constant dense<0.000000e+00> : vector<32x128xf32>
    %4 = tpu.matmul %0, %3, %cst {dimension_numbers = #tpu.dot_dimension_numbers<[1], [0], [0], [1], [0, 0, 1, 1], [], []>} : vector<32x4xf32>, vector<4x128xf32>, vector<32x128xf32> -> vector<32x128xf32>
    %cst_6 = arith.constant 0.000000e+00 : f32
    %cst_7 = arith.constant 6.000000e+00 : f32
    %5 = vector.broadcast %cst_6 : f32 to vector<32x128xf32>
    %6 = arith.maximumf %5, %4 : vector<32x128xf32>
    %7 = vector.broadcast %cst_7 : f32 to vector<32x128xf32>
    %8 = arith.minimumf %7, %6 : vector<32x128xf32>
    %cst_8 = arith.constant dense<0.000000e+00> : vector<16x128xf32>
    %9 = tpu.matmul %1, %8, %cst_8 {dimension_numbers = #tpu.dot_dimension_numbers<[1], [0], [0], [1], [0, 0, 1, 1], [], []>} : vector<16x32xf32>, vector<32x128xf32>, vector<16x128xf32> -> vector<16x128xf32>
    %c0_9 = arith.constant 0 : index
    %c0_10 = arith.constant 0 : index
    %c0_11 = arith.constant 0 : index
    %10 = vector.load %arg5[%c0_9, %c0_10, %c0_11] : memref<2x16x128xf32, #tpu.memory_space<vmem>>, vector<1x16x128xf32>
    %11 = vector.shape_cast %10 : vector<1x16x128xf32> to vector<16x128xf32>
    %12 = vector.shape_cast %9 : vector<16x128xf32> to vector<1x16x128xf32>
    tpu.vector_store %arg5[%c0_9, %c0_10, %c0_11], %12 {strides = array<i32>} : memref<2x16x128xf32, #tpu.memory_space<vmem>>, vector<1x16x128xf32>,
    %c1 = arith.constant 1 : index
    %c0_12 = arith.constant 0 : index
    %c0_13 = arith.constant 0 : index
    %13 = vector.load %arg2[%c1, %c0_12, %c0_13] : memref<2x4x128xf32, #tpu.memory_space<vmem>>, vector<1x4x128xf32>
    %14 = vector.shape_cast %13 : vector<1x4x128xf32> to vector<4x128xf32>
    %cst_14 = arith.constant dense<0.000000e+00> : vector<32x128xf32>
    %15 = tpu.matmul %0, %14, %cst_14 {dimension_numbers = #tpu.dot_dimension_numbers<[1], [0], [0], [1], [0, 0, 1, 1], [], []>} : vector<32x4xf32>, vector<4x128xf32>, vector<32x128xf32> -> vector<32x128xf32>
    %cst_15 = arith.constant 0.000000e+00 : f32
    %cst_16 = arith.constant 6.000000e+00 : f32
    %16 = vector.broadcast %cst_15 : f32 to vector<32x128xf32>
    %17 = arith.maximumf %16, %15 : vector<32x128xf32>
    %18 = vector.broadcast %cst_16 : f32 to vector<32x128xf32>
    %19 = arith.minimumf %18, %17 : vector<32x128xf32>
    %cst_17 = arith.constant dense<0.000000e+00> : vector<16x128xf32>
    %20 = tpu.matmul %1, %19, %cst_17 {dimension_numbers = #tpu.dot_dimension_numbers<[1], [0], [0], [1], [0, 0, 1, 1], [], []>} : vector<16x32xf32>, vector<32x128xf32>, vector<16x128xf32> -> vector<16x128xf32>
    %c1_18 = arith.constant 1 : index
    %c0_19 = arith.constant 0 : index
    %c0_20 = arith.constant 0 : index
    %21 = vector.load %arg5[%c1_18, %c0_19, %c0_20] : memref<2x16x128xf32, #tpu.memory_space<vmem>>, vector<1x16x128xf32>
    %22 = vector.shape_cast %21 : vector<1x16x128xf32> to vector<16x128xf32>
    %23 = vector.shape_cast %20 : vector<16x128xf32> to vector<1x16x128xf32>
    tpu.vector_store %arg5[%c1_18, %c0_19, %c0_20], %23 {strides = array<i32>} : memref<2x16x128xf32, #tpu.memory_space<vmem>>, vector<1x16x128xf32>,
    return
  }
  func.func @transform_0(%arg0: i32, %arg1: i32) -> (i32, i32, i32) {
    %c0_i32 = arith.constant 0 : i32
    %c0_i32_0 = arith.constant 0 : i32
    return %arg0, %c0_i32, %arg1 : i32, i32, i32
  }
  func.func @transform_1(%arg0: i32, %arg1: i32) -> (i32, i32) {
    %c0_i32 = arith.constant 0 : i32
    %c0_i32_0 = arith.constant 0 : i32
    %c0_i32_1 = arith.constant 0 : i32
    return %c0_i32, %c0_i32_0 : i32, i32
  }
  func.func @transform_2(%arg0: i32, %arg1: i32) -> (i32, i32) {
    %c0_i32 = arith.constant 0 : i32
    %c0_i32_0 = arith.constant 0 : i32
    %c0_i32_1 = arith.constant 0 : i32
    return %c0_i32, %c0_i32_0 : i32, i32
  }
  func.func @transform_3(%arg0: i32, %arg1: i32) -> (i32, i32, i32) {
    %c0_i32 = arith.constant 0 : i32
    %c0_i32_0 = arith.constant 0 : i32
    return %arg0, %c0_i32, %arg1 : i32, i32, i32
  }
}

</mosaic_0001>

<bundles_post_ra>
// kernel: tpu_custom_call.1
= control target key start
LH: loop header
LB: loop body
LE: loop exit
PB: predicated region body
PF: predicated region fallthrough
CT: control target
= control target key end

     0   :  { %8 = vsyncpa [#allocation4], 0  ;;  %s1113_s0 = inlined_call_operand.vmem [shape: f32[2,4,256], index: 0, kind: input, shape index: {}]   ;;  %s1114_s1 = inlined_call_operand.vmem [shape: f32[32,4], index: 1, kind: input, shape index: {}]   ;;  %s1115_s2 = inlined_call_operand.vmem [shape: f32[16,32], index: 2, kind: input, shape index: {}]   ;;  %s1116_s3 = inlined_call_operand.hbm [shape: f32[2,16,256], index: 3, kind: output, shape index: {}]  }
   0x1   :  { %10 = vsyncpa [#allocation4 + $0x1], 0  ;;  %s960_s12 = smov 0   ;;  %s962_s13 = smov 0  }
   0x2   :  { %s964_s14 = smov 0   ;;  %s966_s15 = smov 0  }
   0x3   :  { %s968_s16 = smov 0   ;;  %s970_s17 = smov 0  }
   0x4 LB: > { %s710_s18 = sadd.s32 4294967295, %s934_s17   ;;  %s711_s19 = sadd.s32 4294967294, %s934_s17   ;;  %s934_s17 = sphi %s970_s17, %s16_s17   ;;  %s930_s16 = sphi %s968_s16, %s1123_s16   ;;  %s926_s15 = sphi %s966_s15, %s1122_s15   ;;  %s922_s14 = sphi %s964_s14, %s1121_s14   ;;  %s918_s13 = sphi %s962_s13, %s1120_s13   ;;  %s914_s12 = sphi %s960_s12, %s1119_s12  }
   0x5   : > { %s25_s20 = sadd.s32 1, %s930_s16  ;;  %s37_s21 = sadd.s32 1, %s922_s14 }
   0x6   : > { %p26_p0 = scmp.ge.s32.totalorder %s25_s20, 2  ;;  %p44_p1 = scmp.ne.s32.totalorder %s922_s14, %s918_s13 }
   0x7   : > { %p45_p2 = scmp.eq.s32.totalorder %s934_s17, 0  ;;  %p118_p3 = scmp.eq.s32.totalorder %s710_s18, 1 }
   0x8   : > { %s1125_s20 = smov (%p26_p0, %s25_s20), 0  ;;  %p123_p6 = scmp.ne.s32.totalorder %s918_s13, %s914_s12 }
   0x9   : > { %p46_p4 = por %p45_p2, %p44_p1  ;;  %p999_p5 = por %p118_p3, %p44_p1 }
   0xa   : > { %s33_s23 = ssub.s32 %s930_s16, %s1125_s20  ;;  %p124_p8 = scmp.eq.s32.totalorder %s711_s19, 1 }
   0xb   : > { %p35_p7 = scmp.eq.s32.totalorder %s33_s23, 0  ;;  %p713_p10 = scmp.ge.s32.totalorder %s934_s17, 2 }
   0xc   : > { %p1010_p9 = por %p124_p8, %p123_p6 }
   0xd   : > { %s1008_s24 = scalar_select %p35_p7, %s922_s14, %s37_s21  }
   0xe   : > { %146 = sbr.rel (%p713_p10) target bundleno = 24 (0x18), region = 24 }
  0x13   : > { %149 = sbr.rel (!%p46_p4) target bundleno = 24 (0x18), region = 28  ;;  %s151_s26 = sand.u32 (%p46_p4), 1, %s922_s14  }
  0x14   : > { %s715_s27 = sshll.u32 (%p46_p4), %s930_s16, 2  ;;  %s714_s28 = sshll.u32 (%p46_p4), %s151_s26, 3 }
  0x15   : > { %s158_s4 = scalar_lea.vmem (%p46_p4), %s1113_s0, %s715_s27  ;;  %s153_s5 = scalar_lea.vmem (%p46_p4), [#allocation2], %s714_s28 }
  0x16   : > { %v175_v0 = vld [vmem:[%s158_s4] sm:$0xf] (%p46_p4)  ;;  %v177_v1 = vld [vmem:[%s158_s4 + $0x8] sm:$0xf] (%p46_p4) }
  0x17   : > { %176 = vst [vmem:[%s153_s5] sm:$0xf] (%p46_p4), %v175_v0  ;;  %178 = vst [vmem:[%s153_s5 + $0x4] sm:$0xf] (%p46_p4), %v177_v1 }
  0x18 PF: > { %p716_p11 = scmp.ge.s32.totalorder %s934_s17, 1  ;;  %p205_p12 = scmp.lt.s32.totalorder %s934_s17, 3 }
  0x1a   : > { %p206_p13 = pnand %p716_p11, %p205_p12 }
  0x1b   : > { %s1025_s6 = sand.u32 (!%p206_p13), 1, %s918_s13   ;;  %s737_s8 = sshll.u32 (!%p206_p13), %s926_s15, 7 }
  0x1c   : > { %209 = sbr.rel (%p206_p13) target bundleno = 464 (0x1d0), region = 69  ;;  %s717_s9 = sshll.u32 (!%p206_p13), %s1025_s6, 3 }
  0x1d   : > { %s214_s10 = scalar_lea.vmem (!%p206_p13), [#allocation2], %s717_s9  ;;  %s718_s4 = sshll.u32 (!%p206_p13), %s1025_s6, 5 }
  0x1e   : > { %s234_s5 = scalar_lea.vmem (!%p206_p13), [#allocation3], %s718_s4  ;;  %s1065_s11 = scalar_lea.hbm (!%p206_p13), %s1116_s3, %s737_s8 }
  0x1f   : > { %s630_s7 = sshll.u32 (!%p206_p13), %s234_s5, 4  ;;  %s615_s18 = scalar_lea.sflag (!%p206_p13), [#allocation4], %s1025_s6  ;;  %s1060_s7 = int_to_ptr.vmem [resolvable:$true] %s630_s7 }
  0x20   : > { %s858_s19 = scalar_lea.vmem (!%p206_p13), %s1060_s7, 512  ;;  %s936_s15 = smov (!%p206_p13), [#allocation3]  }
  0x21   : > { %v237_v2 = vld [vmem:[%s1114_s1] sm:$0xff]  ;;  %vm244_vm0 = vcmask 31744   ;;  %vm257_vm1 = vcmask 1043456   ;;  %v238_v5 = vld [vmem:[%s1114_s1 + $0x8] sm:$0xff]  ;;  %v239_v6 = vld [vmem:[%s1114_s1 + $0x10] sm:$0xff]  ;;  %vm354_vm2 = vcmask 261120   ;;  %p859_p0 = scmp.ne.s32.totalorder %s1060_s7, %s858_s19 }
  0x22   : > { %764 = vmatprep.mubr.msk.f32.mxu0 %vm244_vm0, %v237_v2  ;;  %v243_v3 = vld [vmem:[%s214_s10] sm:$0xf]  ;;  %v726_v4 = vld [vmem:[%s214_s10 + $0x4] sm:$0xf]  ;;  %v240_v7 = vld [vmem:[%s1114_s1 + $0x18] sm:$0xff]  ;;  %s862_s21 = sshll.u32 %s936_s15, 4  ;;  %s863_s21 = int_to_ptr.vmem [resolvable:$false] %s862_s21 }
  0x23   : > { %762 = vmatprep.subr.msk.mxu0 %vm257_vm1, %v243_v3  ;;  %v241_v8 = vld [vmem:[%s1115_s2] sm:$0xff]  ;;  %v242_v26 = vld [vmem:[%s1115_s2 + $0x8] sm:$0xff]  ;;  %p860_p1 = pnand %p859_p0, %p999_p5  ;;  %s864_s23 = scalar_lea.vmem %s863_s21, 1024 }
  0x24   : > { %763 = vmatpush3.msk.msra.mxu0 %vm257_vm1, %v243_v3  ;;  %778 = vmatprep.mubr.msk.f32.mxu1 %vm354_vm2, %v241_v8  ;;  %p865_p3 = scmp.lt.s32.totalorder %s1060_s7, %s863_s21  ;;  %p866_p4 = scmp.lt.s32.totalorder %s864_s23, %s858_s19 }
  0x25   : > { %765 = vmatmul.mubr.msk.f32.vlgmr.msra.gmra.mxu0 %vm244_vm0, %v238_v5  ;;  %781 = vmatprep.subr.msk.mxu0 %vm257_vm1, %v726_v4  ;;  %p861_p2 = pneg %p860_p1 }
  0x26   : > { %782 = vmatpush3.msk.msra.mxu0 %vm257_vm1, %v726_v4  ;;  %767 = vmatprep.mubr.msk.f32.mxu0 %vm244_vm0, %v239_v6  ;;  %p867_p6 = por %p866_p4, %p865_p3 }
  0x28   : > { %p868_p7 = pnand %p867_p6, %p861_p2 }
  0x29   : > { %768 = vmatmul.mubr.msk.f32.gmra.mxu0 %vm244_vm0, %v240_v7 }
  0x2a   : > { %783 = vmatprep.mubr.msk.f32.mxu0 %vm244_vm0, %v237_v2 }
  0x2d   : > { %784 = vmatmul.mubr.msk.f32.vlgmr.msra.gmra.mxu0 %vm244_vm0, %v238_v5 }
  0x2e   : > { %786 = vmatprep.mubr.msk.f32.mxu0 %vm244_vm0, %v239_v6 }
  0x31   : > { %787 = vmatmul.mubr.msk.f32.gmra.mxu0 %vm244_vm0, %v240_v7 }
  0xe5   : > { %v766_v9 = vpop.f32.mrf.mxu0 }
  0xe6   : > { %v347_v14 = vmax.f32 %v766_v9, 0.0 }
  0xe7   : > { %v327_v10 = vpop.f32.mrf.mxu0 }
  0xe8   : > { %v346_v18 = vmax.f32 %v327_v10, 0.0  ;;  %v351_v21 = vmin.f32 %v347_v14, 6.0 }
  0xe9   : > { %v769_v11 = vpop.f32.mrf.mxu0 }
  0xea   : > { %v349_v12 = vmax.f32 %v769_v11, 0.0  ;;  %v350_v23 = vmin.f32 %v346_v18, 6.0 }
  0xeb   : > { %v337_v13 = vpop.f32.mrf.mxu0 }
  0xec   : > { %v353_v15 = vmin.f32 %v349_v12, 6.0  ;;  %v348_v16 = vmax.f32 %v337_v13, 0.0 }
  0xed   : > { %v785_v17 = vpop.f32.mrf.mxu0 }
  0xee   : > { %v352_v19 = vmin.f32 %v348_v16, 6.0  ;;  %770 = vmatprep.subr.mxu1 %v353_v15  ;;  %v529_v27 = vmax.f32 %v785_v17, 0.0 }
  0xef   : > { %771 = vmatpush3.msra.mxu1 %v353_v15  ;;  %v509_v20 = vpop.f32.mrf.mxu0 }
  0xf0   : > { %772 = vmatprep.subr.mxu1 %v352_v19  ;;  %v528_v30 = vmax.f32 %v509_v20, 0.0  ;;  %v533_v32 = vmin.f32 %v529_v27, 6.0 }
  0xf1   : > { %773 = vmatpush3.msra.mxu1 %v352_v19  ;;  %v788_v22 = vpop.f32.mrf.mxu0 }
  0xf2   : > { %v531_v24 = vmax.f32 %v788_v22, 0.0  ;;  %774 = vmatprep.subr.mxu1 %v351_v21  ;;  %v532_v33 = vmin.f32 %v528_v30, 6.0 }
  0xf3   : > { %775 = vmatpush3.msra.mxu1 %v351_v21  ;;  %v519_v25 = vpop.f32.mrf.mxu0 }
  0xf4   : > { %v535_v28 = vmin.f32 %v531_v24, 6.0  ;;  %v530_v29 = vmax.f32 %v519_v25, 0.0  ;;  %776 = vmatprep.subr.mxu1 %v350_v23 }
  0xf5   : > { %777 = vmatpush3.msra.mxu1 %v350_v23 }
  0xf6   : > { %v534_v31 = vmin.f32 %v530_v29, 6.0  ;;  %779 = vmatmul.mubr.msk.f32.vlgmr.msra.gmra.mxu1 %vm354_vm2, %v242_v26  ;;  %789 = vmatprep.subr.mxu1 %v535_v28 }
  0xf7   : > { %790 = vmatpush3.msra.mxu1 %v535_v28  ;;  %797 = vmatprep.mubr.msk.f32.mxu1 %vm354_vm2, %v241_v8 }
  0xf8   : > { %791 = vmatprep.subr.mxu1 %v534_v31 }
  0xf9   : > { %792 = vmatpush3.msra.mxu1 %v534_v31 }
  0xfa   : > { %793 = vmatprep.subr.mxu1 %v533_v32 }
  0xfb   : > { %794 = vmatpush3.msra.mxu1 %v533_v32 }
  0xfc   : > { %795 = vmatprep.subr.mxu1 %v532_v33 }
  0xfd   : > { %796 = vmatpush3.msra.mxu1 %v532_v33 }
  0xfe   : > { %798 = vmatmul.mubr.msk.f32.vlgmr.msra.gmra.mxu1 %vm354_vm2, %v242_v26 }
 0x1b6   : > { %v780_v34 = vpop.f32.mrf.mxu1 }
 0x1b7   : > { %437 = vst [vmem:[%s234_s5 + $0x8] sm:$0xff] %v780_v34 }
 0x1b8   : > { %v427_v35 = vpop.f32.mrf.mxu1 }
 0x1b9   : > { %436 = vst [vmem:[%s234_s5] sm:$0xff] %v427_v35 }
 0x1be   : > { %v799_v36 = vpop.f32.mrf.mxu1 }
 0x1bf   : > { %735 = vst [vmem:[%s234_s5 + $0x18] sm:$0xff] %v799_v36 }
 0x1c0   : > { %v602_v37 = vpop.f32.mrf.mxu1 }
 0x1c1   : > { %734 = vst [vmem:[%s234_s5 + $0x10] sm:$0xff] %v602_v37 }
 0x1c2   : > { %871 = shalt.err (!%p868_p7)
}
 0x1c3   : > { %s872_s26 = scalar_lea.hbm %s1065_s11, 512  ;;  %s876_s29 = scalar_lea.hbm %s1116_s3, 1024 }
 0x1c4   : > { %p873_p8 = scmp.ne.s32.totalorder %s1065_s11, %s872_s26  ;;  %p877_p13 = scmp.lt.s32.totalorder %s1065_s11, %s1116_s3 }
 0x1c5   : > { %p878_p0 = scmp.lt.s32.totalorder %s876_s29, %s872_s26 }
 0x1c6   : > { %p874_p11 = pnand %p873_p8, %p999_p5 }
 0x1c7   : > { %p879_p1 = por %p878_p0, %p877_p13 }
 0x1c8   : > { %p875_p12 = pneg %p874_p11 }
 0x1ca   : > { %p880_p2 = pnand %p879_p1, %p875_p12 }
 0x1cc   : > { %883 = shalt.err (!%p880_p2)
}
 0x1cd   : > { %s937_s5 = smov 128   ;;  %s938_s8 = smov 256  }
 0x1ce   : > { %s939_s9 = smov 8  }
 0x1cf   : > { %800 = dma.vmem_to_hbm [thread:$0]  (%p999_p5), %s1060_s7, 512, %s1065_s11, %s615_s18, %s937_s5, %s938_s8, %s939_s9  }
 0x1d0 PF: > { %s645_s10 = sand.u32 1, %s914_s12   ;;  %p803_p3 = pnand %p713_p10, %p1010_p9 }
 0x1d1   : > { %s646_s19 = scalar_lea.sflag [#allocation4], %s645_s10 }
 0x1d2   : > { %p804_p4 = pneg %p803_p3 }
 0x1d4   : > { %909 = dma.done.wait (%p804_p4), %s646_s19, 512  }
 0x1d5   : > { %911 = vsyncadd (%p804_p4), %s646_s19, 4294966784  ;;  %s16_s17 = sadd.s32 1, %s934_s17   ;;  %s1119_s12 = smov %s918_s13 }
 0x1d6   : > { %p13_p6 = scmp.ge.s32.totalorder %s16_s17, 4   ;;  %s1120_s13 = smov %s922_s14 }
 0x1d7   : > { %s1121_s14 = smov %s1008_s24  ;;  %s1122_s15 = smov %s930_s16 }
 0x1d8   : > { %s1123_s16 = smov %s1125_s20  ;;  %15 = sbr.rel (!%p13_p6) target bundleno = 4 (0x4), region = 115 }
 0x1dd   :  { %651 = vsyncpa [#allocation4], 1 }
 0x1de   :  { %653 = vsyncpa [#allocation4 + $0x1], 1 }

</bundles_post_ra>
